<compile_context>
chip_gen: v5e
topology: v5e:2x2
jax: 0.10.0
libtpu: 0.0.40
codegen_flags: <defaults>
</compile_context>

<pallas_src>
import functools

import jax
import jax.numpy as jnp
from jax.experimental import pallas as pl
from jax.experimental.pallas import tpu as pltpu


def _round_up(v, m):
    return -(-v // m) * m


def _classifier_kernel(x_ref, wf_ref, bf_ref, w1_ref, b1_ref, w2_ref, b2_ref,
                       out_ref, h_acc, *, c_pad, block_f, wf_resident):
    k = pl.program_id(1)

    @pl.when(k == 0)
    def _():
        h_acc[...] = jnp.zeros_like(h_acc)

    # Shared feature matmul, K-tiled: bf16 x bf16 -> f32 accumulation on MXU.
    if wf_resident:
        # wf lives fully in VMEM (DMA'd once); slice the current K tile.
        start = pl.multiple_of(k * block_f, block_f)
        wf_tile = wf_ref[pl.ds(start, block_f), :]
    else:
        wf_tile = wf_ref[...]
    h_acc[...] += jnp.dot(x_ref[...], wf_tile,
                          preferred_element_type=jnp.float32)

    @pl.when(k == pl.num_programs(1) - 1)
    def _():
        # Shared feature: ReLU(x @ Wf + bf); feed heads in the weights' dtype
        # (bf16) so the MXU runs its native bf16-in / f32-accumulate path.
        h = jnp.maximum(h_acc[...] + bf_ref[...], 0.0).astype(w1_ref.dtype)

        # Fused head-1: [Wc1 | Wd1] -> one matmul, one bias add, one ReLU.
        h1 = jnp.dot(h, w1_ref[...], preferred_element_type=jnp.float32) + b1_ref[...]
        h1 = jnp.maximum(h1, 0.0).astype(w2_ref.dtype)

        # Fused head-2: block-diag(Wc2, Wd2), lane-dense; padded bias columns
        # hold -1e30 so their exp underflows to exactly 0 (b2 stays f32).
        logits = jnp.dot(h1, w2_ref[...], preferred_element_type=jnp.float32) + b2_ref[...]

        lc = logits[:, :c_pad]
        ld = logits[:, c_pad:]
        ec = jnp.exp(lc - jnp.max(lc, axis=-1, keepdims=True))
        ed = jnp.exp(ld - jnp.max(ld, axis=-1, keepdims=True))
        out_ref[:, :c_pad] = ec * pl.reciprocal(
            jnp.sum(ec, axis=-1, keepdims=True), approx=True)
        out_ref[:, c_pad:] = ed * pl.reciprocal(
            jnp.sum(ed, axis=-1, keepdims=True), approx=True)


def _vmem_estimate(block_b, block_f, Fp, H, H1, CDp, itemsize, wf_resident):
    x_b = 2 * block_b * block_f * itemsize                      # x tile, 2 bufs
    wf_b = 2 * (Fp if wf_resident else block_f) * H * itemsize  # wf (resident or tile)
    w1_b = 2 * H * H1 * itemsize
    w2_b = 2 * H1 * CDp * itemsize
    bias_b = 2 * (H + H1 + CDp) * 4
    out_b = 2 * block_b * CDp * 4
    acc_b = block_b * H * 4
    return x_b + wf_b + w1_b + w2_b + bias_b + out_b + acc_b


def disease_classifier_forward(x, params, *, block_b=None, block_f=None,
                               wf_resident=None, compute_dtype=jnp.bfloat16):
    """x: (B, F).  params: dict of (in,out) weights and (1,out) biases (f32).

    Returns (celltype_probs (B, C) f32, disease_probs (B, D) f32).
    """
    B, F = x.shape
    H = params["wf"].shape[1]
    H2c = params["wc1"].shape[1]
    C = params["wc2"].shape[1]
    H2d = params["wd1"].shape[1]
    D = params["wd2"].shape[1]
    H1 = H2c + H2d
    Cp = _round_up(C, 128)
    Dp = _round_up(D, 128)
    CDp = Cp + Dp
    itemsize = jnp.dtype(compute_dtype).itemsize

    # ---- tile sizes -------------------------------------------------------
    auto_bf = block_f is None
    if auto_bf:
        block_f = min(_round_up(F, 128), 2048)   # big K tiles beat step overhead
    block_f = _round_up(block_f, 128)
    Fp = _round_up(F, block_f)

    # Hold wf resident in VMEM (one DMA total) when it is small enough.
    auto_res = wf_resident is None
    if auto_res:
        wf_resident = Fp * H * itemsize <= 12 * 1024 * 1024

    auto_bb = block_b is None
    if auto_bb:
        if B <= 8:
            block_b = 8
        else:
            cap = 256 if wf_resident else 512    # bigger tiles cut wf re-streams
            block_b = min(_round_up(B, 8), cap)
            # >=2 batch tiles: pipelining + v7x megacore sharding.
            block_b = min(block_b, _round_up(-(-B // 2), 8))
    block_b = _round_up(block_b, 8)

    # ---- VMEM budget loop (auto params only) ------------------------------
    budget = 40 * 1024 * 1024
    while True:
        Fp = _round_up(F, block_f)
        est = _vmem_estimate(block_b, block_f, Fp, H, H1, CDp, itemsize, wf_resident)
        if est <= budget:
            break
        if auto_bf and block_f > 256:
            block_f = max(256, (block_f // 2) // 128 * 128)
        elif auto_res and wf_resident:
            wf_resident = False
        elif auto_bb and block_b > 64:
            block_b = max(64, _round_up(block_b // 2, 8))
        else:
            break
    Fp = _round_up(F, block_f)
    Bp = _round_up(B, block_b)
    vmem_limit = int(min(48 * 1024 * 1024, max(est + est // 4 + (2 << 20), 16 << 20)))

    # ---- operand packing (plain JAX, outside the kernel) ------------------
    x_c = x.astype(compute_dtype)
    if (Bp, Fp) != (B, F):
        x_c = jnp.pad(x_c, ((0, Bp - B), (0, Fp - F)))

    wf = params["wf"].astype(compute_dtype)
    if Fp != F:
        wf = jnp.pad(wf, ((0, Fp - F), (0, 0)))
    bf = params["bf"].astype(jnp.float32)

    w1 = jnp.concatenate([params["wc1"], params["wd1"]], axis=1).astype(compute_dtype)
    b1 = jnp.concatenate([params["bc1"], params["bd1"]], axis=1).astype(jnp.float32)

    w2 = jnp.zeros((H1, CDp), jnp.float32)
    w2 = w2.at[:H2c, :C].set(params["wc2"].astype(jnp.float32))
    w2 = w2.at[H2c:, Cp:Cp + D].set(params["wd2"].astype(jnp.float32))
    w2 = w2.astype(compute_dtype)

    b2 = jnp.full((1, CDp), -1e30, jnp.float32)          # keep f32 (pad trick)
    b2 = b2.at[:, :C].set(params["bc2"].astype(jnp.float32))
    b2 = b2.at[:, Cp:Cp + D].set(params["bd2"].astype(jnp.float32))

    # ---- pallas_call ------------------------------------------------------
    grid = (Bp // block_b, Fp // block_f)

    def inv(shape):  # grid-invariant operand (same block every step)
        return pl.BlockSpec(shape, lambda i, k: (0, 0))

    if wf_resident:
        wf_spec = inv((Fp, H))                                   # one DMA total
    else:
        wf_spec = pl.BlockSpec((block_f, H), lambda i, k: (k, 0))  # streamed K-tile

    in_specs = [
        pl.BlockSpec((block_b, block_f), lambda i, k: (i, k)),   # x tile
        wf_spec,                                                 # wf
        inv((1, H)),                                             # bf
        inv((H, H1)), inv((1, H1)),                              # fused head-1
        inv((H1, CDp)), inv((1, CDp)),                           # fused head-2
    ]
    out_specs = pl.BlockSpec((block_b, CDp), lambda i, k: (i, 0))
    out_shape = jax.ShapeDtypeStruct((Bp, CDp), jnp.float32)

    probs = pl.pallas_call(
        functools.partial(_classifier_kernel, c_pad=Cp, block_f=block_f,
                          wf_resident=wf_resident),
        out_shape=out_shape,
        grid_spec=pltpu.PrefetchScalarGridSpec(
            num_scalar_prefetch=0,
            grid=grid,
            in_specs=in_specs,
            out_specs=out_specs,
            scratch_shapes=[pltpu.VMEM((block_b, H), jnp.float32)],
        ),
        compiler_params=pltpu.CompilerParams(
            dimension_semantics=("parallel", "arbitrary"),
            vmem_limit_bytes=vmem_limit,
        ),
    )(x_c, wf, bf, w1, b1, w2, b2)

    celltype = probs[:B, :C]
    disease = probs[:B, Cp:Cp + D]
    return celltype, disease


def _reference_forward(x, p):
    h = jax.nn.relu(x @ p["wf"] + p["bf"])
    ct = jax.nn.softmax(jax.nn.relu(h @ p["wc1"] + p["bc1"]) @ p["wc2"] + p["bc2"], axis=1)
    ds = jax.nn.softmax(jax.nn.relu(h @ p["wd1"] + p["bd1"]) @ p["wd2"] + p["bd2"], axis=1)
    return ct, ds


if __name__ == "__main__":
    # Small synthetic dims consistent with the module's MLP structure.
    B, F, H, H2, C, D = 8, 256, 64, 32, 16, 8

    key = jax.random.PRNGKey(0)
    ks = jax.random.split(key, 11)

    def init_w(k, shape, fan_in):
        return jax.random.uniform(k, shape, jnp.float32, -1.0, 1.0) / jnp.sqrt(fan_in)

    raw = {
        "wf":  init_w(ks[0], (F, H), F),   "bf":  init_w(ks[1], (1, H), F),
        "wc1": init_w(ks[2], (H, H2), H),  "bc1": init_w(ks[3], (1, H2), H),
        "wc2": init_w(ks[4], (H2, C), H2), "bc2": init_w(ks[5], (1, C), H2),
        "wd1": init_w(ks[6], (H, H2), H),  "bd1": init_w(ks[7], (1, H2), H),
        "wd2": init_w(ks[8], (H2, D), H2), "bd2": init_w(ks[9], (1, D), H2),
    }
    # The kernel streams weights / activations as bf16; quantize them up front so
    # the f32 reference uses the identical values (fair parity check).
    q = lambda a: a.astype(jnp.bfloat16).astype(jnp.float32)
    params = {k: (q(v) if k.startswith("w") else v) for k, v in raw.items()}
    x = q(jax.random.normal(ks[10], (B, F), jnp.float32))

    ct_ref, ds_ref = _reference_forward(x, params)

    # block_f=128 -> 2 K-tiles; exercise both the resident-wf (in-kernel pl.ds
    # slice) and streamed-wf (K-tiled BlockSpec) paths.
    for resident in (True, False):
        celltype, disease = disease_classifier_forward(
            x, params, block_f=128, wf_resident=resident)
        jax.block_until_ready((celltype, disease))
        assert celltype.shape == (B, C) and disease.shape == (B, D)
        assert jnp.allclose(celltype, ct_ref, atol=1e-3, rtol=1e-3), \
            (resident, float(jnp.max(jnp.abs(celltype - ct_ref))))
        assert jnp.allclose(disease, ds_ref, atol=1e-3, rtol=1e-3), \
            (resident, float(jnp.max(jnp.abs(disease - ds_ref))))

    # Default (auto tile-size) path as well.
    celltype, disease = disease_classifier_forward(x, params)
    jax.block_until_ready((celltype, disease))
    assert jnp.allclose(celltype, ct_ref, atol=1e-3, rtol=1e-3)
    assert jnp.allclose(disease, ds_ref, atol=1e-3, rtol=1e-3)

    print("KERNEL_OK")
</pallas_src>

<mosaic_0001>
module attributes {stable_mosaic.version = 11 : i64} {
  func.func @_classifier_kernel(%arg0: i32, %arg1: i32, %arg2: memref<8x128xbf16, #tpu.memory_space<vmem>>, %arg3: memref<256x64xbf16, #tpu.memory_space<vmem>>, %arg4: memref<1x64xf32, #tpu.memory_space<vmem>>, %arg5: memref<64x64xbf16, #tpu.memory_space<vmem>>, %arg6: memref<1x64xf32, #tpu.memory_space<vmem>>, %arg7: memref<64x256xbf16, #tpu.memory_space<vmem>>, %arg8: memref<1x256xf32, #tpu.memory_space<vmem>>, %arg9: memref<8x256xf32, #tpu.memory_space<vmem>>, %arg10: memref<8x64xf32, #tpu.memory_space<vmem>>) attributes {dimension_semantics = [#tpu.dimension_semantics<parallel>, #tpu.dimension_semantics<arbitrary>], iteration_bounds = array<i64: 1, 2>, scalar_prefetch = 0 : i64, scratch_operands = 1 : i64, tpu.core_type = #tpu.core_type<tc>, window_params = [{transform_indices = @transform_0, window_bounds = array<i64: 8, 128>}, {pipeline_mode = #tpu.pipeline_mode<synchronous>, transform_indices = @transform_1, window_bounds = array<i64: 256, 64>}, {pipeline_mode = #tpu.pipeline_mode<synchronous>, transform_indices = @transform_2, window_bounds = array<i64: 1, 64>}, {pipeline_mode = #tpu.pipeline_mode<synchronous>, transform_indices = @transform_3, window_bounds = array<i64: 64, 64>}, {pipeline_mode = #tpu.pipeline_mode<synchronous>, transform_indices = @transform_4, window_bounds = array<i64: 1, 64>}, {pipeline_mode = #tpu.pipeline_mode<synchronous>, transform_indices = @transform_5, window_bounds = array<i64: 64, 256>}, {pipeline_mode = #tpu.pipeline_mode<synchronous>, transform_indices = @transform_6, window_bounds = array<i64: 1, 256>}, {transform_indices = @transform_7, window_bounds = array<i64: 8, 256>}]} {
    %c0_i32 = arith.constant 0 : i32
    %0 = arith.cmpi eq, %arg1, %c0_i32 : i32
    %1 = arith.extui %0 : i1 to i32
    %c0_i32_0 = arith.constant 0 : i32
    %2 = arith.cmpi ne, %1, %c0_i32_0 : i32
    scf.if %2 {
      %cst_8 = arith.constant 0.000000e+00 : f32
      %15 = vector.broadcast %cst_8 : f32 to vector<8x64xf32>
      %c0_9 = arith.constant 0 : index
      %c0_10 = arith.constant 0 : index
      %16 = vector.load %arg10[%c0_9, %c0_10] : memref<8x64xf32, #tpu.memory_space<vmem>>, vector<8x64xf32>
      tpu.vector_store %arg10[%c0_9, %c0_10], %15 {strides = array<i32>} : memref<8x64xf32, #tpu.memory_space<vmem>>, vector<8x64xf32>,
    } else {
    }
    %c128_i32 = arith.constant 128 : i32
    %3 = arith.muli %arg1, %c128_i32 : i32
    %4 = tpu.assume_multiple %3, 128 : i32
    %5 = arith.index_cast %4 : i32 to index
    %c0 = arith.constant 0 : index
    %6 = vector.load %arg3[%5, %c0] : memref<256x64xbf16, #tpu.memory_space<vmem>>, vector<128x64xbf16>
    %c0_1 = arith.constant 0 : index
    %c0_2 = arith.constant 0 : index
    %7 = vector.load %arg10[%c0_1, %c0_2] : memref<8x64xf32, #tpu.memory_space<vmem>>, vector<8x64xf32>
    %c0_3 = arith.constant 0 : index
    %c0_4 = arith.constant 0 : index
    %8 = vector.load %arg2[%c0_3, %c0_4] : memref<8x128xbf16, #tpu.memory_space<vmem>>, vector<8x128xbf16>
    %cst = arith.constant dense<0.000000e+00> : vector<8x64xf32>
    %9 = tpu.matmul %8, %6, %cst {dimension_numbers = #tpu.dot_dimension_numbers<[1], [0], [0], [1], [0, 0, 1, 1], [], []>} : vector<8x128xbf16>, vector<128x64xbf16>, vector<8x64xf32> -> vector<8x64xf32>
    %10 = arith.addf %7, %9 : vector<8x64xf32>
    %c0_5 = arith.constant 0 : index
    %c0_6 = arith.constant 0 : index
    %11 = vector.load %arg10[%c0_5, %c0_6] : memref<8x64xf32, #tpu.memory_space<vmem>>, vector<8x64xf32>
    tpu.vector_store %arg10[%c0_5, %c0_6], %10 {strides = array<i32>} : memref<8x64xf32, #tpu.memory_space<vmem>>, vector<8x64xf32>,
    %c1_i32 = arith.constant 1 : i32
    %12 = arith.cmpi eq, %arg1, %c1_i32 : i32
    %13 = arith.extui %12 : i1 to i32
    %c0_i32_7 = arith.constant 0 : i32
    %14 = arith.cmpi ne, %13, %c0_i32_7 : i32
    scf.if %14 {
      %c0_8 = arith.constant 0 : index
      %c0_9 = arith.constant 0 : index
      %15 = vector.load %arg10[%c0_8, %c0_9] : memref<8x64xf32, #tpu.memory_space<vmem>>, vector<8x64xf32>
      %c0_10 = arith.constant 0 : index
      %c0_11 = arith.constant 0 : index
      %16 = vector.load %arg4[%c0_10, %c0_11] : memref<1x64xf32, #tpu.memory_space<vmem>>, vector<1x64xf32>
      %17 = vector.broadcast %16 : vector<1x64xf32> to vector<8x64xf32>
      %18 = arith.addf %15, %17 : vector<8x64xf32>
      %cst_12 = arith.constant 0.000000e+00 : f32
      %19 = vector.broadcast %cst_12 : f32 to vector<8x64xf32>
      %20 = arith.maximumf %18, %19 : vector<8x64xf32>
      %21 = arith.truncf %20 : vector<8x64xf32> to vector<8x64xbf16>
      %c0_13 = arith.constant 0 : index
      %c0_14 = arith.constant 0 : index
      %22 = vector.load %arg5[%c0_13, %c0_14] : memref<64x64xbf16, #tpu.memory_space<vmem>>, vector<64x64xbf16>
      %cst_15 = arith.constant dense<0.000000e+00> : vector<8x64xf32>
      %23 = tpu.matmul %21, %22, %cst_15 {dimension_numbers = #tpu.dot_dimension_numbers<[1], [0], [0], [1], [0, 0, 1, 1], [], []>} : vector<8x64xbf16>, vector<64x64xbf16>, vector<8x64xf32> -> vector<8x64xf32>
      %c0_16 = arith.constant 0 : index
      %c0_17 = arith.constant 0 : index
      %24 = vector.load %arg6[%c0_16, %c0_17] : memref<1x64xf32, #tpu.memory_space<vmem>>, vector<1x64xf32>
      %25 = vector.broadcast %24 : vector<1x64xf32> to vector<8x64xf32>
      %26 = arith.addf %23, %25 : vector<8x64xf32>
      %cst_18 = arith.constant 0.000000e+00 : f32
      %27 = vector.broadcast %cst_18 : f32 to vector<8x64xf32>
      %28 = arith.maximumf %26, %27 : vector<8x64xf32>
      %29 = arith.truncf %28 : vector<8x64xf32> to vector<8x64xbf16>
      %c0_19 = arith.constant 0 : index
      %c0_20 = arith.constant 0 : index
      %30 = vector.load %arg7[%c0_19, %c0_20] : memref<64x256xbf16, #tpu.memory_space<vmem>>, vector<64x256xbf16>
      %cst_21 = arith.constant dense<0.000000e+00> : vector<8x256xf32>
      %31 = tpu.matmul %29, %30, %cst_21 {dimension_numbers = #tpu.dot_dimension_numbers<[1], [0], [0], [1], [0, 0, 1, 1], [], []>} : vector<8x64xbf16>, vector<64x256xbf16>, vector<8x256xf32> -> vector<8x256xf32>
      %c0_22 = arith.constant 0 : index
      %c0_23 = arith.constant 0 : index
      %32 = vector.load %arg8[%c0_22, %c0_23] : memref<1x256xf32, #tpu.memory_space<vmem>>, vector<1x256xf32>
      %33 = vector.broadcast %32 : vector<1x256xf32> to vector<8x256xf32>
      %34 = arith.addf %31, %33 : vector<8x256xf32>
      %35 = vector.extract_strided_slice %34 {offsets = [0, 0], sizes = [8, 128], strides = [1, 1]} : vector<8x256xf32> to vector<8x128xf32>
      %36 = vector.extract_strided_slice %34 {offsets = [0, 128], sizes = [8, 128], strides = [1, 1]} : vector<8x256xf32> to vector<8x128xf32>
      %cst_24 = arith.constant dense<0xFF800000> : vector<8xf32>
      %37 = vector.multi_reduction <maximumf>, %35, %cst_24 [1] : vector<8x128xf32> to vector<8xf32>
      %38 = vector.shape_cast %37 : vector<8xf32> to vector<8x1xf32>
      %39 = vector.broadcast %38 : vector<8x1xf32> to vector<8x128xf32>
      %40 = arith.subf %35, %39 : vector<8x128xf32>
      %41 = math.exp %40 : vector<8x128xf32>
      %cst_25 = arith.constant dense<0xFF800000> : vector<8xf32>
      %42 = vector.multi_reduction <maximumf>, %36, %cst_25 [1] : vector<8x128xf32> to vector<8xf32>
      %43 = vector.shape_cast %42 : vector<8xf32> to vector<8x1xf32>
      %44 = vector.broadcast %43 : vector<8x1xf32> to vector<8x128xf32>
      %45 = arith.subf %36, %44 : vector<8x128xf32>
      %46 = math.exp %45 : vector<8x128xf32>
      %cst_26 = arith.constant dense<0.000000e+00> : vector<8xf32>
      %47 = vector.multi_reduction <add>, %41, %cst_26 [1] : vector<8x128xf32> to vector<8xf32>
      %48 = vector.shape_cast %47 : vector<8xf32> to vector<8x1xf32>
      %49 = tpu.reciprocal %48 {approx = true} : vector<8x1xf32> -> vector<8x1xf32>
      %50 = vector.broadcast %49 : vector<8x1xf32> to vector<8x128xf32>
      %51 = arith.mulf %41, %50 : vector<8x128xf32>
      %c0_27 = arith.constant 0 : index
      %c0_28 = arith.constant 0 : index
      %52 = vector.load %arg9[%c0_27, %c0_28] : memref<8x256xf32, #tpu.memory_space<vmem>>, vector<8x128xf32>
      tpu.vector_store %arg9[%c0_27, %c0_28], %51 {strides = array<i32>} : memref<8x256xf32, #tpu.memory_space<vmem>>, vector<8x128xf32>,
      %cst_29 = arith.constant dense<0.000000e+00> : vector<8xf32>
      %53 = vector.multi_reduction <add>, %46, %cst_29 [1] : vector<8x128xf32> to vector<8xf32>
      %54 = vector.shape_cast %53 : vector<8xf32> to vector<8x1xf32>
      %55 = tpu.reciprocal %54 {approx = true} : vector<8x1xf32> -> vector<8x1xf32>
      %56 = vector.broadcast %55 : vector<8x1xf32> to vector<8x128xf32>
      %57 = arith.mulf %46, %56 : vector<8x128xf32>
      %c0_30 = arith.constant 0 : index
      %c128 = arith.constant 128 : index
      %58 = vector.load %arg9[%c0_30, %c128] : memref<8x256xf32, #tpu.memory_space<vmem>>, vector<8x128xf32>
      tpu.vector_store %arg9[%c0_30, %c128], %57 {strides = array<i32>} : memref<8x256xf32, #tpu.memory_space<vmem>>, vector<8x128xf32>,
    } else {
    }
    return
  }
  func.func @transform_0(%arg0: i32, %arg1: i32) -> (i32, i32) {
    %c0_i32 = arith.constant 0 : i32
    return %arg0, %arg1 : i32, i32
  }
  func.func @transform_1(%arg0: i32, %arg1: i32) -> (i32, i32) {
    %c0_i32 = arith.constant 0 : i32
    %c0_i32_0 = arith.constant 0 : i32
    %c0_i32_1 = arith.constant 0 : i32
    return %c0_i32, %c0_i32_0 : i32, i32
  }
  func.func @transform_2(%arg0: i32, %arg1: i32) -> (i32, i32) {
    %c0_i32 = arith.constant 0 : i32
    %c0_i32_0 = arith.constant 0 : i32
    %c0_i32_1 = arith.constant 0 : i32
    return %c0_i32, %c0_i32_0 : i32, i32
  }
  func.func @transform_3(%arg0: i32, %arg1: i32) -> (i32, i32) {
    %c0_i32 = arith.constant 0 : i32
    %c0_i32_0 = arith.constant 0 : i32
    %c0_i32_1 = arith.constant 0 : i32
    return %c0_i32, %c0_i32_0 : i32, i32
  }
  func.func @transform_4(%arg0: i32, %arg1: i32) -> (i32, i32) {
    %c0_i32 = arith.constant 0 : i32
    %c0_i32_0 = arith.constant 0 : i32
    %c0_i32_1 = arith.constant 0 : i32
    return %c0_i32, %c0_i32_0 : i32, i32
  }
  func.func @transform_5(%arg0: i32, %arg1: i32) -> (i32, i32) {
    %c0_i32 = arith.constant 0 : i32
    %c0_i32_0 = arith.constant 0 : i32
    %c0_i32_1 = arith.constant 0 : i32
    return %c0_i32, %c0_i32_0 : i32, i32
  }
  func.func @transform_6(%arg0: i32, %arg1: i32) -> (i32, i32) {
    %c0_i32 = arith.constant 0 : i32
    %c0_i32_0 = arith.constant 0 : i32
    %c0_i32_1 = arith.constant 0 : i32
    return %c0_i32, %c0_i32_0 : i32, i32
  }
  func.func @transform_7(%arg0: i32, %arg1: i32) -> (i32, i32) {
    %c0_i32 = arith.constant 0 : i32
    %c0_i32_0 = arith.constant 0 : i32
    return %arg0, %c0_i32 : i32, i32
  }
}

</mosaic_0001>

<bundles_post_ra>
// kernel: tpu_custom_call.1
= control target key start
LH: loop header
LB: loop body
LE: loop exit
PB: predicated region body
PF: predicated region fallthrough
CT: control target
= control target key end

     0   :  { %12 = vsyncpa [#allocation4], 0  ;;  %s882_s24 = smov 0   ;;  %s884_s25 = smov 0   ;;  %s1001_s0 = inlined_call_operand.vmem [shape: bf16[8,256], index: 0, kind: input, shape index: {}]   ;;  %s1002_s1 = inlined_call_operand.vmem [shape: bf16[256,64], index: 1, kind: input, shape index: {}]   ;;  %s1003_s2 = inlined_call_operand.vmem [shape: f32[1,64], index: 2, kind: input, shape index: {}]   ;;  %s1004_s3 = inlined_call_operand.vmem [shape: bf16[64,64], index: 3, kind: input, shape index: {}]   ;;  %s1005_s4 = inlined_call_operand.vmem [shape: f32[1,64], index: 4, kind: input, shape index: {}]   ;;  %s1006_s5 = inlined_call_operand.vmem [shape: bf16[64,256], index: 5, kind: input, shape index: {}]   ;;  %s1007_s6 = inlined_call_operand.vmem [shape: f32[1,256], index: 6, kind: input, shape index: {}]   ;;  %s1008_s7 = inlined_call_operand.hbm [shape: f32[8,256], index: 7, kind: output, shape index: {}]  }
   0x1   :  { %s886_s26 = smov 0  }
   0x2 LB: > { %s626_s27 = sadd.s32 4294967295, %s838_s26   ;;  %s27_s28 = sadd.s32 1, %s834_s25  ;;  %s838_s26 = sphi %s886_s26, %s18_s26   ;;  %s834_s25 = sphi %s884_s25, %s1010_s25   ;;  %s830_s24 = sphi %s882_s24, %s1009_s24  }
   0x3   : > { %p28_p0 = scmp.ge.s32.totalorder %s27_s28, 2  ;;  %p629_p1 = scmp.ge.s32.totalorder %s838_s26, 1 }
   0x4   : > { %p255_p2 = scmp.lt.s32.totalorder %s838_s26, 3 }
   0x5   : > { %s1012_s28 = smov (%p28_p0, %s27_s28), 0 }
   0x6   : > { %p256_p3 = pnand %p629_p1, %p255_p2 }
   0x7   : > { %p287_p4 = scmp.lt.s32.totalorder (!%p256_p3), %s830_s24, 1  ;;  %p631_p5 = scmp.ne.s32.totalorder (!%p256_p3), %s830_s24, 0 }
   0x8   : > { %259 = sbr.rel (%p256_p3) target bundleno = 734 (0x2de), region = 48 }
   0xd   : > { %s288_s29 = scalar_select %p287_p4, %s830_s24, 1 }
   0xe   : > { %297 = sbr.rel (%p631_p5) target bundleno = 21 (0x15), region = 52 }
   0xf   : > { %s630_s30 = sshll.u32 %s288_s29, 2 }
  0x10   : > { %s292_s10 = scalar_lea.vmem %s1001_s0, %s630_s30 }
  0x13   : > { %vm298_vm0 = vcmask 523264   ;;  %v840_v0 = vmov 0.0  }
  0x14   : > { %299 = vst.msk [vmem:[#allocation2] sm:$0xff] %vm298_vm0, %v840_v0 }
  0x15 PF: > { %s632_s11 = sshll.u32 %s830_s24, 7  ;;  %v322_v9 = vld [vmem:[%s292_s10] sm:$0xf]  ;;  %vm385_vm1 = vcmask 523264   ;;  %p666_p6 = scmp.ne.s32.totalorder %s830_s24, 1 }
  0x16   : > { %s301_s12 = sshra.s32 %s632_s11, 3 }
  0x17   : > { %s633_s13 = sshll.u32 %s301_s12, 2 }
  0x18   : > { %s304_s16 = scalar_lea.vmem %s1002_s1, %s633_s13 }
  0x19   : > { %v729_v1 = vld [vmem:[%s304_s16 + $0x38] sm:$0xff]  ;;  %v728_v2 = vld [vmem:[%s304_s16 + $0x30] sm:$0xff]  ;;  %v727_v3 = vld [vmem:[%s304_s16 + $0x28] sm:$0xff] }
  0x1a   : > { %371 = vmatpush.bf16.msra.mxu0 %v729_v1  ;;  %v726_v4 = vld [vmem:[%s304_s16 + $0x20] sm:$0xff]  ;;  %v725_v5 = vld [vmem:[%s304_s16 + $0x18] sm:$0xff]  ;;  %v724_v6 = vld [vmem:[%s304_s16 + $0x10] sm:$0xff] }
  0x1b   : > { %v723_v7 = vld [vmem:[%s304_s16 + $0x8] sm:$0xff]  ;;  %v722_v8 = vld [vmem:[%s304_s16] sm:$0xff] }
  0x1c   : > { %v321_v10 = vld [vmem:[#allocation2] sm:$0xff] }
  0x1e   : > { %372 = vmatpush.bf16.msra.mxu0 %v728_v2 }
  0x22   : > { %373 = vmatpush.bf16.msra.mxu0 %v727_v3 }
  0x26   : > { %374 = vmatpush.bf16.msra.mxu0 %v726_v4 }
  0x2a   : > { %375 = vmatpush.bf16.msra.mxu0 %v725_v5 }
  0x2e   : > { %376 = vmatpush.bf16.msra.mxu0 %v724_v6 }
  0x32   : > { %377 = vmatpush.bf16.msra.mxu0 %v723_v7 }
  0x36   : > { %378 = vmatpush.bf16.msra.mxu0 %v722_v8 }
  0x39   : > { %379 = vmatmul.bf16.vlgmr.msra.gmra.mxu0 %v322_v9 }
  0xb6   : > { %v380_v11 = vpop.f32.mrf.mxu0 }
  0xb7   : > { %v384_v12 = vadd.f32 %v380_v11, %v321_v10 }
  0xb9   : > { %386 = vst.msk [vmem:[#allocation2] sm:$0xff] %vm385_vm1, %v384_v12 }
  0xba   : > { %390 = sbr.rel (%p666_p6) target bundleno = 728 (0x2d8), region = 56 }
  0xbe   : > { %v382_v13 = vpop.f32.mrf.mxu0 }
  0xbf   : > { %v733_v14 = vld [vmem:[%s1004_s3 + $0x18] sm:$0xff]  ;;  %v732_v15 = vld [vmem:[%s1004_s3 + $0x10] sm:$0xff]  ;;  %v774_v17 = vld [vmem:[%s1003_s2] ss:$0 sm:$0xff] }
  0xc0   : > { %v391_v16 = vld [vmem:[#allocation2] sm:$0xff]  ;;  %442 = vmatpush.bf16.msra.mxu0 %v733_v14  ;;  %v710_v18 = vld [vmem:[%s1006_s5 + $0x30] sm:$0xf]  ;;  %v741_v19 = vld [vmem:[%s1006_s5 + $0x34] sm:$0xf0] }
  0xc1   : > { %v711_v20 = vor.u32 %v741_v19, %v710_v18  ;;  %v740_v21 = vld [vmem:[%s1006_s5 + $0x34] sm:$0xf]  ;;  %v712_v22 = vld [vmem:[%s1006_s5 + $0x38] sm:$0xf0]  ;;  %v702_v23 = vld [vmem:[%s1006_s5 + $0x20] sm:$0xf]  ;;  %v396_v28 = vadd.f32 %v774_v17, %v391_v16 }
  0xc2   : > { %v715_v24 = vor.u32 %v740_v21, %v712_v22  ;;  %v739_v25 = vld [vmem:[%s1006_s5 + $0x24] sm:$0xf0]  ;;  %v738_v26 = vld [vmem:[%s1006_s5 + $0x24] sm:$0xf]  ;;  %v704_v27 = vld [vmem:[%s1006_s5 + $0x28] sm:$0xf0] }
  0xc3   : > { %514 = vmatpush.bf16.msra.mxu1 %v711_v20  ;;  %v703_v29 = vor.u32 %v739_v25, %v702_v23  ;;  %v731_v30 = vld [vmem:[%s1004_s3 + $0x8] sm:$0xff]  ;;  %v707_v31 = vor.u32 %v738_v26, %v704_v27  ;;  %v397_v32 = vmax.f32 %v396_v28, 0.0  ;;  %v730_v33 = vld [vmem:[%s1004_s3] sm:$0xff]  ;;  %v694_v35 = vld [vmem:[%s1006_s5 + $0x10] sm:$0xf] }
  0xc4   : > { %443 = vmatpush.bf16.msra.mxu0 %v732_v15  ;;  %527 = vmatpush.bf16.msra.mxu2 %v715_v24  ;;  %v737_v36 = vld [vmem:[%s1006_s5 + $0x14] sm:$0xf0]  ;;  %v736_v37 = vld [vmem:[%s1006_s5 + $0x14] sm:$0xf]  ;;  %v696_v39 = vld [vmem:[%s1006_s5 + $0x18] sm:$0xf0] }
  0xc5   : > { %v398_v34 = vpack.c.bf16 %v397_v32, %v397_v32  ;;  %v695_v38 = vor.u32 %v737_v36, %v694_v35  ;;  %v699_v40 = vor.u32 %v736_v37, %v696_v39  ;;  %v686_v41 = vld [vmem:[%s1006_s5] sm:$0xf]  ;;  %v735_v42 = vld [vmem:[%s1006_s5 + $0x4] sm:$0xf0]  ;;  %v734_v43 = vld [vmem:[%s1006_s5 + $0x4] sm:$0xf] }
  0xc6   : > { %v687_v44 = vor.u32 %v735_v42, %v686_v41  ;;  %v688_v45 = vld [vmem:[%s1006_s5 + $0x8] sm:$0xf0]  ;;  %v775_v47 = vld [vmem:[%s1005_s4] ss:$0 sm:$0xff] }
  0xc7   : > { %515 = vmatpush.bf16.msra.mxu1 %v703_v29  ;;  %v691_v46 = vor.u32 %v734_v43, %v688_v45  ;;  %v461_v53 = vld [vmem:[%s1007_s6] sm:$0x3] }
  0xc8   : > { %444 = vmatpush.bf16.msra.mxu0 %v731_v30  ;;  %528 = vmatpush.bf16.msra.mxu2 %v707_v31  ;;  %v463_v54 = vperm.slane %v461_v53, 0  ;;  %v464_v57 = vperm.slane %v461_v53, 1 }
  0xcb   : > { %516 = vmatpush.bf16.msra.mxu1 %v695_v38 }
  0xcc   : > { %445 = vmatpush.bf16.msra.mxu0 %v730_v33  ;;  %529 = vmatpush.bf16.msra.mxu2 %v699_v40 }
  0xcf   : > { %683 = vmatmul.msk.bf16.vlgmr.msra.gmra.mxu0 %vm385_vm1, %v398_v34  ;;  %517 = vmatpush.bf16.msra.mxu1 %v687_v44 }
  0xd0   : > { %530 = vmatpush.bf16.msra.mxu2 %v691_v46 }
 0x14c   : > { %v447_v48 = vpop.f32.mrf.mxu0 }
 0x14d   : > { %v448_v49 = vadd.f32 %v775_v47, %v447_v48 }
 0x14f   : > { %v451_v50 = vmax.f32 %v448_v49, 0.0 }
 0x151   : > { %v452_v51 = vpack.c.bf16 %v451_v50, %v451_v50 }
 0x153   : > { %716 = vmatmul.msk.bf16.vlgmr.msra.gmra.mxu1 %vm385_vm1, %v452_v51  ;;  %717 = vmatmul.msk.bf16.vlgmr.msra.gmra.mxu2 %vm385_vm1, %v452_v51 }
 0x154   : > { %v449_v52 = vpop.f32.mrf.mxu0 }
 0x1d0   : > { %v519_v55 = vpop.f32.mrf.mxu1 }
 0x1d1   : > { %v520_v56 = vadd.f32 %v519_v55, %v463_v54 }
 0x1d3   : > { %536 = vmax.xlane.f32.xlu0 %v520_v56 }
 0x1d6   : > { %v532_v58 = vpop.f32.mrf.mxu2 }
 0x1d7   : > { %v533_v60 = vadd.f32 %v532_v58, %v464_v57 }
 0x1d8   : > { %v521_v59 = vpop.f32.mrf.mxu1 }
 0x1db   : > { %541 = vmax.xlane.f32.xlu0 %v533_v60 }
 0x1de   : > { %v534_v61 = vpop.f32.mrf.mxu2 }
 0x246   : > { %v537_v62 = vpop.xlane.xlu0 %536 }
 0x247   : > { %v538_v63 = vsub.f32 %v520_v56, %v537_v62 }
 0x249   : > { %v539_v0 = vmul.f32 1.442695, %v538_v63 }
 0x24b   : > { %776 = vpow2.f32 %v539_v0 }
 0x24e   : > { %v542_v1 = vpop.xlane.xlu0 %541 }
 0x24f   : > { %v543_v2 = vsub.f32 %v533_v60, %v542_v1 }
 0x251   : > { %v777_v3 = vpop.eup %776  ;;  %v544_v4 = vmul.f32 1.442695, %v543_v2 }
 0x252   : > { %546 = vadd.xlane.f32.xlu1 %v777_v3 }
 0x253   : > { %778 = vpow2.f32 %v544_v4 }
 0x259   : > { %v779_v5 = vpop.eup %778 }
 0x25a   : > { %551 = vadd.xlane.f32.xlu1 %v779_v5 }
 0x2c5   : > { %v547_v6 = vpop.xlane.xlu1 %546 }
 0x2c6   : > { %780 = vrcp.f32 %v547_v6 }
 0x2cc   : > { %v781_v7 = vpop.eup %780 }
 0x2cd   : > { %v549_v8 = vmul.f32 %v781_v7, %v777_v3  ;;  %v552_v9 = vpop.xlane.xlu1 %551 }
 0x2ce   : > { %782 = vrcp.f32 %v552_v9 }
 0x2cf   : > { %550 = vst [vmem:[#allocation3] sm:$0xff] %v549_v8 }
 0x2d4   : > { %v783_v10 = vpop.eup %782 }
 0x2d5   : > { %v554_v11 = vmul.f32 %v783_v10, %v779_v5 }
 0x2d7   : > { %555 = vst [vmem:[#allocation3 + $0x8] sm:$0xff] %v554_v11 }
 0x2d8 PF: > { %p746_p7 = scmp.eq.s32.totalorder %s626_s27, 1  ;;  %s567_s8 = sshll.u32 %s1008_s7, 4  ;;  %s568_s8 = int_to_ptr.hbm [resolvable:$true] %s567_s8 }
 0x2d9   : > { %s841_s9 = smov [#allocation3]  }
 0x2da   : > { %s565_s10 = sshll.u32 %s841_s9, 4  ;;  %s566_s10 = int_to_ptr.vmem [resolvable:$true] %s565_s10 }
 0x2db   : > { %743 = dma.vmem_to_hbm [thread:$0]  (%p746_p7), %s566_s10, 256, %s568_s8, [#allocation4]  }
 0x2dc   : > { %825 = dma.done.wait (%p746_p7), [#allocation4], 256  }
 0x2dd   : > { %827 = vsyncadd (%p746_p7), [#allocation4], 4294967040 }
 0x2de PF: > { %s18_s26 = sadd.s32 1, %s838_s26   ;;  %s1009_s24 = smov %s834_s25 }
 0x2df   : > { %p15_p8 = scmp.ge.s32.totalorder %s18_s26, 4   ;;  %s1010_s25 = smov %s1012_s28 }
 0x2e1   :  { %17 = sbr.rel (!%p15_p8) target bundleno = 2 (0x2), region = 85 }
 0x2e6   :  { %581 = vsyncpa [#allocation4], 1 }
 0x2e7   :  { %583 = vsyncpa [#allocation4 + $0x1], 1 }

</bundles_post_ra>
